<compile_context>
chip_gen: v7x
topology: tpu7x:2x2x1
jax: 0.10.0
libtpu: 0.0.40
codegen_flags: <defaults>
</compile_context>

<pallas_src>
import jax
import jax.numpy as jnp
from jax import lax
from jax.experimental import pallas as pl
from jax.experimental.pallas import tpu as pltpu

# ------------------------- model dimensions (small) -------------------------
HIDDEN = 32        # stands in for XLNet's 768
FFN = 64           # stands in for XLNet's 3072
SEQ = 8            # ctx_len (<= 512, so only one encoder window is needed)
BATCH = 2
VOCAB = 50
N_TYPES = 5        # token_type (answer_indicator) vocabulary
EPS = 1e-5

assert HIDDEN <= FFN, "bias-slab packing assumes LN rows fit in an FFN-wide slab"

# Row layout of the packed bias/LayerNorm slab (shape (8, FFN), zero padded).
_LN1_G, _LN1_B, _FFN_B1, _FFN_B2, _LN2_G, _LN2_B = range(6)


def _layernorm(h, g, b):
    mu = jnp.mean(h, axis=-1, keepdims=True)
    d = h - mu
    var = jnp.mean(d * d, axis=-1, keepdims=True)
    return d * lax.rsqrt(var + EPS) * g + b


# ------------------------------ Pallas kernel -------------------------------
# One grid step == one batch element (grid axis marked "parallel").
def _dia_xlnet_kernel(
    wtok_ref,       # (S, H)   gathered word-embedding rows for this batch elem
    ttok_ref,       # (S, H)   gathered token-type-embedding rows
    pos_ref,        # (S, H)   position-embedding table
    wqkv_ref,       # (H, 3H)  fused Q|K|V projection (scale folded into Q)
    wo_ref,         # (H, H)   attention output projection
    w1_ref,         # (H, F)   FFN in
    w2_ref,         # (F, H)   FFN out
    wse_t_ref,      # (2, H)   linear_start_end, pre-transposed (lane-dense)
    slab_ref,       # (8, F)   packed LN gains/biases + FFN biases
    out_ref,        # (2, S)   logits for this batch element (start row, end row)
):
    H, F = HIDDEN, FFN

    # --- fused embedding add (word + token_type + position): plain adds, no
    #     concatenate / relayout --------------------------------------------
    x = wtok_ref[...] + ttok_ref[...] + pos_ref[...]                   # (S, H)

    # --- fused QKV projection: one (H, 3H) MXU push ------------------------
    qkv = jnp.dot(x, wqkv_ref[...], preferred_element_type=jnp.float32)  # (S, 3H)
    q = qkv[:, 0 * H:1 * H]        # 1/sqrt(H) already folded into wqkv's Q cols
    k = qkv[:, 1 * H:2 * H]
    v = qkv[:, 2 * H:3 * H]

    # --- single-head self-attention ----------------------------------------
    # q @ k^T without materialising a transpose: contract over H.
    scores = lax.dot_general(q, k, (((1,), (1,)), ((), ())),
                             preferred_element_type=jnp.float32)       # (S, S)
    m = jnp.max(scores, axis=-1, keepdims=True)
    p = jnp.exp(scores - m)
    # NOTE: approx reciprocal (EUP vrcp) deviates from exact softmax at the
    # ~1e-3 relative level; fine for argmax-based start/end extraction.
    p = p * pl.reciprocal(jnp.sum(p, axis=-1, keepdims=True), approx=True)
    attn = jnp.dot(p, v, preferred_element_type=jnp.float32)           # (S, H)
    attn = jnp.dot(attn, wo_ref[...], preferred_element_type=jnp.float32)

    # Packed LN/bias rows; each row is consumed exactly once below, so a
    # single implicit broadcast per parameter is the minimum possible.
    slab = slab_ref[...]                                               # (8, F)

    # --- post-LayerNorm 1 ---------------------------------------------------
    h = _layernorm(x + attn,
                   slab[_LN1_G:_LN1_G + 1, :H],
                   slab[_LN1_B:_LN1_B + 1, :H])

    # --- feed-forward (Linear -> ReLU -> Linear) ----------------------------
    f = jnp.dot(h, w1_ref[...], preferred_element_type=jnp.float32)
    f = jnp.maximum(f + slab[_FFN_B1:_FFN_B1 + 1, :F], 0.0)
    f = jnp.dot(f, w2_ref[...], preferred_element_type=jnp.float32)
    f = f + slab[_FFN_B2:_FFN_B2 + 1, :H]

    # --- post-LayerNorm 2 ---------------------------------------------------
    h2 = _layernorm(h + f,
                    slab[_LN2_G:_LN2_G + 1, :H],
                    slab[_LN2_B:_LN2_B + 1, :H])

    # --- linear_start_end: (2, H) x (S, H) contracted over the lane dim ----
    # (transpose-free MXU form; weight tile is lane-dense.)
    logits_t = lax.dot_general(wse_t_ref[...], h2, (((1,), (1,)), ((), ())),
                               preferred_element_type=jnp.float32)     # (2, S)
    out_ref[...] = logits_t.astype(out_ref.dtype)


def _cost_estimate(B, S, H, F):
    flops_per_batch = (
        2 * S * H * (3 * H)      # fused QKV projection
        + 2 * S * S * H          # q @ k^T
        + 2 * S * S * H          # p @ v
        + 2 * S * H * H          # attention output projection
        + 2 * S * H * F          # FFN in
        + 2 * S * F * H          # FFN out
        + 2 * S * H * 2          # start/end head
        + 14 * S * H             # rough VPU (embedding adds, LN, biases)
    )
    transcendentals = B * (S * S + 3 * S)           # exp + 2 rsqrt + recip
    bytes_accessed = 4 * (
        2 * B * S * H                               # wtok + ttok
        + S * H                                     # pos
        + H * 3 * H + H * H + H * F + F * H         # weights
        + 2 * H + 8 * F                             # head + bias slab
        + B * 2 * S                                 # output
    )
    return pl.CostEstimate(flops=B * flops_per_batch,
                           transcendentals=transcendentals,
                           bytes_accessed=bytes_accessed)


# ------------------------------ JAX wrapper ---------------------------------
@jax.jit
def dia_xlnet_forward(context, context_lens, answer_indicator,
                      question, question_indicator, question_lens, params):
    """Mirrors DiaXLNet.forward: returns (start_logits, end_logits, None)."""
    # The reference forward never uses question*/context_lens for the logits.
    del context_lens, question, question_indicator, question_lens
    B, S = context.shape
    assert S <= 512, "ctx_len > 512 window path not implemented"
    assert S <= params["pos_emb"].shape[0], "grow pos_emb before raising SEQ"

    # Embedding gathers stay in XLA; the sum is fused into the kernel.
    # TODO(synk): at real dims, fuse the gather via PrefetchScalarGridSpec.
    wtok = params["word_emb"][context]                         # (B, S, H)
    ttok = params["type_emb"][answer_indicator]                # (B, S, H)
    pos = params["pos_emb"][:S]                                # (S, H)

    H, F = HIDDEN, FFN

    def const(shape):
        return pl.BlockSpec(shape, lambda b: tuple(0 for _ in shape))

    per_batch_act = pl.BlockSpec((None, S, H), lambda b: (b, 0, 0))

    logits = pl.pallas_call(
        _dia_xlnet_kernel,
        out_shape=jax.ShapeDtypeStruct((B, 2, S), jnp.float32),
        grid=(B,),                         # one batch element per grid step
        in_specs=[
            per_batch_act,                 # wtok   (kernel sees (S, H))
            per_batch_act,                 # ttok
            const((S, H)),                 # pos
            const((H, 3 * H)),             # wqkv
            const((H, H)),                 # wo
            const((H, F)),                 # ffn w1
            const((F, H)),                 # ffn w2
            const((2, H)),                 # w_start_end (pre-transposed)
            const((8, F)),                 # bias slab
        ],
        out_specs=pl.BlockSpec((None, 2, S), lambda b: (b, 0, 0)),
        compiler_params=pltpu.CompilerParams(
            dimension_semantics=("parallel",)),   # 2 TCs on v7x, no-op on v5e/v6e
        cost_estimate=_cost_estimate(B, S, H, F),
    )(wtok, ttok, pos,
      params["wqkv"], params["wo"], params["ffn_w1"], params["ffn_w2"],
      params["wse_t"], params["bias_slab"])

    start_logits = logits[:, 0, :]          # (B, S)
    end_logits = logits[:, 1, :]            # (B, S)
    return start_logits, end_logits, None


# -------------------------- deterministic parameters -------------------------
def init_params(key):
    ks = jax.random.split(key, 10)
    std = 0.02
    return {
        "word_emb": jax.random.normal(ks[0], (VOCAB, HIDDEN), jnp.float32) * std,
        "type_emb": jax.random.normal(ks[1], (N_TYPES, HIDDEN), jnp.float32) * std,
        "pos_emb": jax.random.normal(ks[2], (SEQ, HIDDEN), jnp.float32) * std,
        "wq": jax.random.normal(ks[3], (HIDDEN, HIDDEN), jnp.float32) * std,
        "wk": jax.random.normal(ks[4], (HIDDEN, HIDDEN), jnp.float32) * std,
        "wv": jax.random.normal(ks[5], (HIDDEN, HIDDEN), jnp.float32) * std,
        "wo": jax.random.normal(ks[6], (HIDDEN, HIDDEN), jnp.float32) * std,
        "ln1_g": jnp.ones((1, HIDDEN), jnp.float32),
        "ln1_b": jnp.zeros((1, HIDDEN), jnp.float32),
        "ffn_w1": jax.random.normal(ks[7], (HIDDEN, FFN), jnp.float32) * std,
        "ffn_b1": jnp.zeros((1, FFN), jnp.float32),
        "ffn_w2": jax.random.normal(ks[8], (FFN, HIDDEN), jnp.float32) * std,
        "ffn_b2": jnp.zeros((1, HIDDEN), jnp.float32),
        "ln2_g": jnp.ones((1, HIDDEN), jnp.float32),
        "ln2_b": jnp.zeros((1, HIDDEN), jnp.float32),
        "w_start_end": jax.random.normal(ks[9], (HIDDEN, 2), jnp.float32) * std,
    }


def fuse_params(raw):
    """One-time (outside the forward pass) parameter fusion/packing."""
    scale = 1.0 / (HIDDEN ** 0.5)
    # Fold the attention scale into the Q columns; fuse Q|K|V into one matmul.
    wqkv = jnp.concatenate([raw["wq"] * scale, raw["wk"], raw["wv"]], axis=1)
    # Pre-transpose the start/end head to (2, H): lane-dense weight tile and a
    # transpose-free lane-dim contraction inside the kernel.
    wse_t = raw["w_start_end"].T
    # Pack the six tiny (1,H)/(1,F) vectors into a single (8, F) slab.
    slab = jnp.zeros((8, FFN), jnp.float32)
    for row, vec in ((_LN1_G, raw["ln1_g"]), (_LN1_B, raw["ln1_b"]),
                     (_FFN_B1, raw["ffn_b1"]), (_FFN_B2, raw["ffn_b2"]),
                     (_LN2_G, raw["ln2_g"]), (_LN2_B, raw["ln2_b"])):
        v = vec.reshape(-1)
        slab = slab.at[row, :v.shape[0]].set(v)
    return {
        "word_emb": raw["word_emb"],
        "type_emb": raw["type_emb"],
        "pos_emb": raw["pos_emb"],
        "wqkv": wqkv,
        "wo": raw["wo"],
        "ffn_w1": raw["ffn_w1"],
        "ffn_w2": raw["ffn_w2"],
        "wse_t": wse_t,
        "bias_slab": slab,
    }


if __name__ == "__main__":
    key = jax.random.PRNGKey(0)
    pkey, ckey, akey, qkey, qikey = jax.random.split(key, 5)

    params = fuse_params(init_params(pkey))

    context = jax.random.randint(ckey, (BATCH, SEQ), 0, VOCAB, dtype=jnp.int32)
    context_lens = jnp.full((BATCH,), SEQ, dtype=jnp.int32)
    answer_indicator = jax.random.randint(akey, (BATCH, SEQ), 0, N_TYPES, dtype=jnp.int32)
    question = jax.random.randint(qkey, (BATCH, SEQ), 0, VOCAB, dtype=jnp.int32)
    question_indicator = jax.random.randint(qikey, (BATCH, SEQ), 0, N_TYPES, dtype=jnp.int32)
    question_lens = jnp.full((BATCH,), SEQ, dtype=jnp.int32)

    start_logits, end_logits, yesno = dia_xlnet_forward(
        context, context_lens, answer_indicator,
        question, question_indicator, question_lens, params)

    jax.block_until_ready((start_logits, end_logits))
    assert start_logits.shape == (BATCH, SEQ)
    assert end_logits.shape == (BATCH, SEQ)
    assert yesno is None
    print("KERNEL_OK")
</pallas_src>

<mosaic_0001>
module attributes {stable_mosaic.version = 11 : i64} {
  func.func @_dia_xlnet_kernel(%arg0: i32, %arg1: memref<1x8x32xf32, #tpu.memory_space<vmem>>, %arg2: memref<1x8x32xf32, #tpu.memory_space<vmem>>, %arg3: memref<8x32xf32, #tpu.memory_space<vmem>>, %arg4: memref<32x96xf32, #tpu.memory_space<vmem>>, %arg5: memref<32x32xf32, #tpu.memory_space<vmem>>, %arg6: memref<32x64xf32, #tpu.memory_space<vmem>>, %arg7: memref<64x32xf32, #tpu.memory_space<vmem>>, %arg8: memref<2x32xf32, #tpu.memory_space<vmem>>, %arg9: memref<8x64xf32, #tpu.memory_space<vmem>>, %arg10: memref<1x2x8xf32, #tpu.memory_space<vmem>>) attributes {dimension_semantics = [#tpu.dimension_semantics<parallel>], iteration_bounds = array<i64: 2>, scalar_prefetch = 0 : i64, scratch_operands = 0 : i64, tpu.core_type = #tpu.core_type<tc>, window_params = [{transform_indices = @transform_0, window_bounds = array<i64: 1, 8, 32>}, {transform_indices = @transform_1, window_bounds = array<i64: 1, 8, 32>}, {pipeline_mode = #tpu.pipeline_mode<synchronous>, transform_indices = @transform_2, window_bounds = array<i64: 8, 32>}, {pipeline_mode = #tpu.pipeline_mode<synchronous>, transform_indices = @transform_3, window_bounds = array<i64: 32, 96>}, {pipeline_mode = #tpu.pipeline_mode<synchronous>, transform_indices = @transform_4, window_bounds = array<i64: 32, 32>}, {pipeline_mode = #tpu.pipeline_mode<synchronous>, transform_indices = @transform_5, window_bounds = array<i64: 32, 64>}, {pipeline_mode = #tpu.pipeline_mode<synchronous>, transform_indices = @transform_6, window_bounds = array<i64: 64, 32>}, {pipeline_mode = #tpu.pipeline_mode<synchronous>, transform_indices = @transform_7, window_bounds = array<i64: 2, 32>}, {pipeline_mode = #tpu.pipeline_mode<synchronous>, transform_indices = @transform_8, window_bounds = array<i64: 8, 64>}, {transform_indices = @transform_9, window_bounds = array<i64: 1, 2, 8>}]} {
    %c0 = arith.constant 0 : index
    %c0_0 = arith.constant 0 : index
    %c0_1 = arith.constant 0 : index
    %0 = vector.load %arg1[%c0, %c0_0, %c0_1] : memref<1x8x32xf32, #tpu.memory_space<vmem>>, vector<1x8x32xf32>
    %1 = vector.shape_cast %0 : vector<1x8x32xf32> to vector<8x32xf32>
    %c0_2 = arith.constant 0 : index
    %c0_3 = arith.constant 0 : index
    %c0_4 = arith.constant 0 : index
    %2 = vector.load %arg2[%c0_2, %c0_3, %c0_4] : memref<1x8x32xf32, #tpu.memory_space<vmem>>, vector<1x8x32xf32>
    %3 = vector.shape_cast %2 : vector<1x8x32xf32> to vector<8x32xf32>
    %4 = arith.addf %1, %3 : vector<8x32xf32>
    %c0_5 = arith.constant 0 : index
    %c0_6 = arith.constant 0 : index
    %5 = vector.load %arg3[%c0_5, %c0_6] : memref<8x32xf32, #tpu.memory_space<vmem>>, vector<8x32xf32>
    %6 = arith.addf %4, %5 : vector<8x32xf32>
    %c0_7 = arith.constant 0 : index
    %c0_8 = arith.constant 0 : index
    %7 = vector.load %arg4[%c0_7, %c0_8] : memref<32x96xf32, #tpu.memory_space<vmem>>, vector<32x96xf32>
    %cst = arith.constant dense<0.000000e+00> : vector<8x96xf32>
    %8 = tpu.matmul %6, %7, %cst {dimension_numbers = #tpu.dot_dimension_numbers<[1], [0], [0], [1], [0, 0, 1, 1], [], []>} : vector<8x32xf32>, vector<32x96xf32>, vector<8x96xf32> -> vector<8x96xf32>
    %9 = vector.extract_strided_slice %8 {offsets = [0, 0], sizes = [8, 32], strides = [1, 1]} : vector<8x96xf32> to vector<8x32xf32>
    %10 = vector.extract_strided_slice %8 {offsets = [0, 32], sizes = [8, 32], strides = [1, 1]} : vector<8x96xf32> to vector<8x32xf32>
    %11 = vector.extract_strided_slice %8 {offsets = [0, 64], sizes = [8, 32], strides = [1, 1]} : vector<8x96xf32> to vector<8x32xf32>
    %cst_9 = arith.constant dense<0.000000e+00> : vector<8x8xf32>
    %12 = tpu.matmul %9, %10, %cst_9 {dimension_numbers = #tpu.dot_dimension_numbers<[1], [1], [0], [0], [0, 0, 1, 0], [], []>} : vector<8x32xf32>, vector<8x32xf32>, vector<8x8xf32> -> vector<8x8xf32>
    %cst_10 = arith.constant dense<0xFF800000> : vector<8xf32>
    %13 = vector.multi_reduction <maximumf>, %12, %cst_10 [1] : vector<8x8xf32> to vector<8xf32>
    %14 = vector.shape_cast %13 : vector<8xf32> to vector<8x1xf32>
    %15 = vector.broadcast %14 : vector<8x1xf32> to vector<8x8xf32>
    %16 = arith.subf %12, %15 : vector<8x8xf32>
    %17 = math.exp %16 : vector<8x8xf32>
    %cst_11 = arith.constant dense<0.000000e+00> : vector<8xf32>
    %18 = vector.multi_reduction <add>, %17, %cst_11 [1] : vector<8x8xf32> to vector<8xf32>
    %19 = vector.shape_cast %18 : vector<8xf32> to vector<8x1xf32>
    %20 = tpu.reciprocal %19 {approx = true} : vector<8x1xf32> -> vector<8x1xf32>
    %21 = vector.broadcast %20 : vector<8x1xf32> to vector<8x8xf32>
    %22 = arith.mulf %17, %21 : vector<8x8xf32>
    %cst_12 = arith.constant dense<0.000000e+00> : vector<8x32xf32>
    %23 = tpu.matmul %22, %11, %cst_12 {dimension_numbers = #tpu.dot_dimension_numbers<[1], [0], [0], [1], [0, 0, 1, 1], [], []>} : vector<8x8xf32>, vector<8x32xf32>, vector<8x32xf32> -> vector<8x32xf32>
    %c0_13 = arith.constant 0 : index
    %c0_14 = arith.constant 0 : index
    %24 = vector.load %arg5[%c0_13, %c0_14] : memref<32x32xf32, #tpu.memory_space<vmem>>, vector<32x32xf32>
    %cst_15 = arith.constant dense<0.000000e+00> : vector<8x32xf32>
    %25 = tpu.matmul %23, %24, %cst_15 {dimension_numbers = #tpu.dot_dimension_numbers<[1], [0], [0], [1], [0, 0, 1, 1], [], []>} : vector<8x32xf32>, vector<32x32xf32>, vector<8x32xf32> -> vector<8x32xf32>
    %c0_16 = arith.constant 0 : index
    %c0_17 = arith.constant 0 : index
    %26 = vector.load %arg9[%c0_16, %c0_17] : memref<8x64xf32, #tpu.memory_space<vmem>>, vector<8x64xf32>
    %27 = arith.addf %6, %25 : vector<8x32xf32>
    %28 = vector.extract_strided_slice %26 {offsets = [0, 0], sizes = [1, 32], strides = [1, 1]} : vector<8x64xf32> to vector<1x32xf32>
    %29 = vector.extract_strided_slice %26 {offsets = [1, 0], sizes = [1, 32], strides = [1, 1]} : vector<8x64xf32> to vector<1x32xf32>
    %cst_18 = arith.constant dense<0.000000e+00> : vector<8xf32>
    %30 = vector.multi_reduction <add>, %27, %cst_18 [1] : vector<8x32xf32> to vector<8xf32>
    %31 = vector.shape_cast %30 : vector<8xf32> to vector<8x1xf32>
    %cst_19 = arith.constant 3.200000e+01 : f32
    %32 = vector.broadcast %cst_19 : f32 to vector<8x1xf32>
    %33 = arith.divf %31, %32 : vector<8x1xf32>
    %34 = vector.broadcast %33 : vector<8x1xf32> to vector<8x32xf32>
    %35 = arith.subf %27, %34 : vector<8x32xf32>
    %36 = arith.mulf %35, %35 : vector<8x32xf32>
    %cst_20 = arith.constant dense<0.000000e+00> : vector<8xf32>
    %37 = vector.multi_reduction <add>, %36, %cst_20 [1] : vector<8x32xf32> to vector<8xf32>
    %38 = vector.shape_cast %37 : vector<8xf32> to vector<8x1xf32>
    %cst_21 = arith.constant 3.200000e+01 : f32
    %39 = vector.broadcast %cst_21 : f32 to vector<8x1xf32>
    %40 = arith.divf %38, %39 : vector<8x1xf32>
    %cst_22 = arith.constant 9.99999974E-6 : f32
    %41 = vector.broadcast %cst_22 : f32 to vector<8x1xf32>
    %42 = arith.addf %40, %41 : vector<8x1xf32>
    %43 = math.rsqrt %42 : vector<8x1xf32>
    %44 = vector.broadcast %43 : vector<8x1xf32> to vector<8x32xf32>
    %45 = arith.mulf %35, %44 : vector<8x32xf32>
    %46 = vector.broadcast %28 : vector<1x32xf32> to vector<8x32xf32>
    %47 = arith.mulf %45, %46 : vector<8x32xf32>
    %48 = vector.broadcast %29 : vector<1x32xf32> to vector<8x32xf32>
    %49 = arith.addf %47, %48 : vector<8x32xf32>
    %c0_23 = arith.constant 0 : index
    %c0_24 = arith.constant 0 : index
    %50 = vector.load %arg6[%c0_23, %c0_24] : memref<32x64xf32, #tpu.memory_space<vmem>>, vector<32x64xf32>
    %cst_25 = arith.constant dense<0.000000e+00> : vector<8x64xf32>
    %51 = tpu.matmul %49, %50, %cst_25 {dimension_numbers = #tpu.dot_dimension_numbers<[1], [0], [0], [1], [0, 0, 1, 1], [], []>} : vector<8x32xf32>, vector<32x64xf32>, vector<8x64xf32> -> vector<8x64xf32>
    %52 = vector.extract_strided_slice %26 {offsets = [2, 0], sizes = [1, 64], strides = [1, 1]} : vector<8x64xf32> to vector<1x64xf32>
    %53 = vector.broadcast %52 : vector<1x64xf32> to vector<8x64xf32>
    %54 = arith.addf %51, %53 : vector<8x64xf32>
    %cst_26 = arith.constant 0.000000e+00 : f32
    %55 = vector.broadcast %cst_26 : f32 to vector<8x64xf32>
    %56 = arith.maximumf %54, %55 : vector<8x64xf32>
    %c0_27 = arith.constant 0 : index
    %c0_28 = arith.constant 0 : index
    %57 = vector.load %arg7[%c0_27, %c0_28] : memref<64x32xf32, #tpu.memory_space<vmem>>, vector<64x32xf32>
    %cst_29 = arith.constant dense<0.000000e+00> : vector<8x32xf32>
    %58 = tpu.matmul %56, %57, %cst_29 {dimension_numbers = #tpu.dot_dimension_numbers<[1], [0], [0], [1], [0, 0, 1, 1], [], []>} : vector<8x64xf32>, vector<64x32xf32>, vector<8x32xf32> -> vector<8x32xf32>
    %59 = vector.extract_strided_slice %26 {offsets = [3, 0], sizes = [1, 32], strides = [1, 1]} : vector<8x64xf32> to vector<1x32xf32>
    %60 = vector.broadcast %59 : vector<1x32xf32> to vector<8x32xf32>
    %61 = arith.addf %58, %60 : vector<8x32xf32>
    %62 = arith.addf %49, %61 : vector<8x32xf32>
    %63 = vector.extract_strided_slice %26 {offsets = [4, 0], sizes = [1, 32], strides = [1, 1]} : vector<8x64xf32> to vector<1x32xf32>
    %64 = vector.extract_strided_slice %26 {offsets = [5, 0], sizes = [1, 32], strides = [1, 1]} : vector<8x64xf32> to vector<1x32xf32>
    %cst_30 = arith.constant dense<0.000000e+00> : vector<8xf32>
    %65 = vector.multi_reduction <add>, %62, %cst_30 [1] : vector<8x32xf32> to vector<8xf32>
    %66 = vector.shape_cast %65 : vector<8xf32> to vector<8x1xf32>
    %cst_31 = arith.constant 3.200000e+01 : f32
    %67 = vector.broadcast %cst_31 : f32 to vector<8x1xf32>
    %68 = arith.divf %66, %67 : vector<8x1xf32>
    %69 = vector.broadcast %68 : vector<8x1xf32> to vector<8x32xf32>
    %70 = arith.subf %62, %69 : vector<8x32xf32>
    %71 = arith.mulf %70, %70 : vector<8x32xf32>
    %cst_32 = arith.constant dense<0.000000e+00> : vector<8xf32>
    %72 = vector.multi_reduction <add>, %71, %cst_32 [1] : vector<8x32xf32> to vector<8xf32>
    %73 = vector.shape_cast %72 : vector<8xf32> to vector<8x1xf32>
    %cst_33 = arith.constant 3.200000e+01 : f32
    %74 = vector.broadcast %cst_33 : f32 to vector<8x1xf32>
    %75 = arith.divf %73, %74 : vector<8x1xf32>
    %cst_34 = arith.constant 9.99999974E-6 : f32
    %76 = vector.broadcast %cst_34 : f32 to vector<8x1xf32>
    %77 = arith.addf %75, %76 : vector<8x1xf32>
    %78 = math.rsqrt %77 : vector<8x1xf32>
    %79 = vector.broadcast %78 : vector<8x1xf32> to vector<8x32xf32>
    %80 = arith.mulf %70, %79 : vector<8x32xf32>
    %81 = vector.broadcast %63 : vector<1x32xf32> to vector<8x32xf32>
    %82 = arith.mulf %80, %81 : vector<8x32xf32>
    %83 = vector.broadcast %64 : vector<1x32xf32> to vector<8x32xf32>
    %84 = arith.addf %82, %83 : vector<8x32xf32>
    %c0_35 = arith.constant 0 : index
    %c0_36 = arith.constant 0 : index
    %85 = vector.load %arg8[%c0_35, %c0_36] : memref<2x32xf32, #tpu.memory_space<vmem>>, vector<2x32xf32>
    %cst_37 = arith.constant dense<0.000000e+00> : vector<2x8xf32>
    %86 = tpu.matmul %85, %84, %cst_37 {dimension_numbers = #tpu.dot_dimension_numbers<[1], [1], [0], [0], [0, 0, 1, 0], [], []>} : vector<2x32xf32>, vector<8x32xf32>, vector<2x8xf32> -> vector<2x8xf32>
    %c0_38 = arith.constant 0 : index
    %c0_39 = arith.constant 0 : index
    %c0_40 = arith.constant 0 : index
    %87 = vector.load %arg10[%c0_38, %c0_39, %c0_40] : memref<1x2x8xf32, #tpu.memory_space<vmem>>, vector<1x2x8xf32>
    %88 = vector.shape_cast %87 : vector<1x2x8xf32> to vector<2x8xf32>
    %89 = vector.shape_cast %86 : vector<2x8xf32> to vector<1x2x8xf32>
    tpu.vector_store %arg10[%c0_38, %c0_39, %c0_40], %89 {strides = array<i32>} : memref<1x2x8xf32, #tpu.memory_space<vmem>>, vector<1x2x8xf32>,
    return
  }
  func.func @transform_0(%arg0: i32) -> (i32, i32, i32) {
    %c0_i32 = arith.constant 0 : i32
    %c0_i32_0 = arith.constant 0 : i32
    %c0_i32_1 = arith.constant 0 : i32
    return %arg0, %c0_i32, %c0_i32_0 : i32, i32, i32
  }
  func.func @transform_1(%arg0: i32) -> (i32, i32, i32) {
    %c0_i32 = arith.constant 0 : i32
    %c0_i32_0 = arith.constant 0 : i32
    %c0_i32_1 = arith.constant 0 : i32
    return %arg0, %c0_i32, %c0_i32_0 : i32, i32, i32
  }
  func.func @transform_2(%arg0: i32) -> (i32, i32) {
    %c0_i32 = arith.constant 0 : i32
    %c0_i32_0 = arith.constant 0 : i32
    %c0_i32_1 = arith.constant 0 : i32
    return %c0_i32, %c0_i32_0 : i32, i32
  }
  func.func @transform_3(%arg0: i32) -> (i32, i32) {
    %c0_i32 = arith.constant 0 : i32
    %c0_i32_0 = arith.constant 0 : i32
    %c0_i32_1 = arith.constant 0 : i32
    return %c0_i32, %c0_i32_0 : i32, i32
  }
  func.func @transform_4(%arg0: i32) -> (i32, i32) {
    %c0_i32 = arith.constant 0 : i32
    %c0_i32_0 = arith.constant 0 : i32
    %c0_i32_1 = arith.constant 0 : i32
    return %c0_i32, %c0_i32_0 : i32, i32
  }
  func.func @transform_5(%arg0: i32) -> (i32, i32) {
    %c0_i32 = arith.constant 0 : i32
    %c0_i32_0 = arith.constant 0 : i32
    %c0_i32_1 = arith.constant 0 : i32
    return %c0_i32, %c0_i32_0 : i32, i32
  }
  func.func @transform_6(%arg0: i32) -> (i32, i32) {
    %c0_i32 = arith.constant 0 : i32
    %c0_i32_0 = arith.constant 0 : i32
    %c0_i32_1 = arith.constant 0 : i32
    return %c0_i32, %c0_i32_0 : i32, i32
  }
  func.func @transform_7(%arg0: i32) -> (i32, i32) {
    %c0_i32 = arith.constant 0 : i32
    %c0_i32_0 = arith.constant 0 : i32
    %c0_i32_1 = arith.constant 0 : i32
    return %c0_i32, %c0_i32_0 : i32, i32
  }
  func.func @transform_8(%arg0: i32) -> (i32, i32) {
    %c0_i32 = arith.constant 0 : i32
    %c0_i32_0 = arith.constant 0 : i32
    %c0_i32_1 = arith.constant 0 : i32
    return %c0_i32, %c0_i32_0 : i32, i32
  }
  func.func @transform_9(%arg0: i32) -> (i32, i32, i32) {
    %c0_i32 = arith.constant 0 : i32
    %c0_i32_0 = arith.constant 0 : i32
    %c0_i32_1 = arith.constant 0 : i32
    return %arg0, %c0_i32, %c0_i32_0 : i32, i32, i32
  }
}

</mosaic_0001>

<bundles_post_ra>
// kernel: dia_xlnet_forward.1
= control target key start
LH: loop header
LB: loop body
LE: loop exit
PB: predicated region body
PF: predicated region fallthrough
CT: control target
= control target key end

     0   :  { %s1262_s30 = smov 0   ;;  %s1396_s0 = inlined_call_operand.vmem [shape: f32[2,8,32], index: 0, kind: input, shape index: {}]   ;;  %s1397_s1 = inlined_call_operand.vmem [shape: f32[2,8,32], index: 1, kind: input, shape index: {}]   ;;  %s1398_s2 = inlined_call_operand.vmem [shape: f32[8,32], index: 2, kind: input, shape index: {}]   ;;  %s1399_s3 = inlined_call_operand.vmem [shape: f32[32,96], index: 3, kind: input, shape index: {}]   ;;  %s1400_s4 = inlined_call_operand.vmem [shape: f32[32,32], index: 4, kind: input, shape index: {}]   ;;  %s1401_s5 = inlined_call_operand.vmem [shape: f32[32,64], index: 5, kind: input, shape index: {}]   ;;  %s1402_s6 = inlined_call_operand.vmem [shape: f32[64,32], index: 6, kind: input, shape index: {}]   ;;  %s1403_s7 = inlined_call_operand.vmem [shape: f32[2,32], index: 7, kind: input, shape index: {}]   ;;  %s1404_s8 = inlined_call_operand.vmem [shape: f32[8,64], index: 8, kind: input, shape index: {}]   ;;  %s1405_s9 = inlined_call_operand.vmem [shape: f32[2,2,8], index: 9, kind: output, shape index: {}]  }
   0x1 LB: > { %s1032_s10 = sadd.s32 4294967295, %s1205_s30   ;;  %p1036_p0 = scmp.ge.s32.totalorder %s1205_s30, 1  ;;  %s1205_s30 = sphi %s1262_s30, %s19_s30  }
   0x2   : > { %p295_p1 = scmp.lt.s32.totalorder %s1205_s30, 3 }
   0x4   : > { %p296_p2 = pnand %p1036_p0, %p295_p1 }
   0x5   : > { %v350_v0 = vld [vmem:[%s1399_s3] sm:$0xff] (!%p296_p2)  ;;  %v351_v1 = vld [vmem:[%s1399_s3 + $0x8] sm:$0xff] (!%p296_p2)  ;;  %v352_v2 = vld [vmem:[%s1399_s3 + $0x10] sm:$0xff] (!%p296_p2)  ;;  %v1207_v3 = vmov (!%p296_p2), 0.0|0.0   ;;  %vm1208_vm0 = vmmov (!%p296_p2), 0   ;;  %v1209_v6 = vmov (!%p296_p2), 0.0   ;;  %v686_v62 = vlaneseq (!%p296_p2) }
   0x6   : > { %299 = sbr.rel (%p296_p2) target bundleno = 2578 (0xa12), region = 56  ;;  %1148 = vmatprep.subr.bf16.mxu1 (!%p296_p2), %v1207_v3  ;;  %v1149_v4 = vpack.c.bf16 (!%p296_p2), %v351_v1, %v350_v0  ;;  %v353_v5 = vld [vmem:[%s1399_s3 + $0x18] sm:$0xff] (!%p296_p2)  ;;  %1089 = vmatprep.mubr.msk.f32.mxu1 (!%p296_p2), %vm1208_vm0, %v1209_v6  ;;  %p333_p3 = scmp.lt.s32.totalorder (!%p296_p2), %s1032_s10, 1  ;;  %v348_v10 = vld [vmem:[%s1398_s2] sm:$0xff] (!%p296_p2)  ;;  %vm354_vm1 = vcmask (!%p296_p2), 261120   ;;  %vm505_vm2 = vcmask (!%p296_p2), 64512  }
   0x7   : > { %1097 = vmatprep.subr.mxu0 (!%p296_p2), %v1209_v6  ;;  %1099 = vmatprep.mubr.msk.f32.mxu0 (!%p296_p2), %vm1208_vm0, %v1209_v6  ;;  %v1152_v7 = vpack.c.bf16 (!%p296_p2), %v353_v5, %v352_v2  ;;  %s1210_s28 = smov (!%p296_p2), 96   ;;  %s1211_s29 = smov (!%p296_p2), 64   ;;  %v593_v26 = vld [vmem:[%s1400_s4] sm:$0xff] (!%p296_p2)  ;;  %v594_v27 = vld [vmem:[%s1400_s4 + $0x8] sm:$0xff] (!%p296_p2)  ;;  %v595_v31 = vld [vmem:[%s1400_s4 + $0x10] sm:$0xff] (!%p296_p2)  ;;  %v687_v0 = vshrl.u32 (!%p296_p2), %v686_v62, 7 }
   0x8   : > { %1150 = vmatpush3.bf16.msra.mxu1 (!%p296_p2), %v1149_v4  ;;  %v1155_v29 = vpack.c.bf16 (!%p296_p2), %v594_v27, %v593_v26  ;;  %v596_v32 = vld [vmem:[%s1400_s4 + $0x18] sm:$0xff] (!%p296_p2)  ;;  %v696_v45 = vld [vmem:[%s1401_s5] sm:$0xff] (!%p296_p2)  ;;  %v697_v46 = vld [vmem:[%s1401_s5 + $0x8] sm:$0xff] (!%p296_p2)  ;;  %vm790_vm3 = vcmask (!%p296_p2), 523264   ;;  %vm965_vm4 = vcmask (!%p296_p2), 58368  }
   0x9   : > { %1151 = vmatprep.subr.bf16.mxu1 (!%p296_p2), %v1207_v3  ;;  %v1158_v33 = vpack.c.bf16 (!%p296_p2), %v596_v32, %v595_v31  ;;  %v1161_v47 = vpack.c.bf16 (!%p296_p2), %v697_v46, %v696_v45  ;;  %v698_v48 = vld [vmem:[%s1401_s5 + $0x10] sm:$0xff] (!%p296_p2)  ;;  %v699_v49 = vld [vmem:[%s1401_s5 + $0x18] sm:$0xff] (!%p296_p2)  ;;  %v778_v51 = vld [vmem:[%s1402_s6] sm:$0xff] (!%p296_p2)  ;;  %v688_v1 = vsub.s32 (!%p296_p2), 0, %v687_v0  ;;  %v693_v4 = vsub.s32 (!%p296_p2), 1, %v687_v0 }
   0xa   : > { %v1164_v50 = vpack.c.bf16 (!%p296_p2), %v699_v49, %v698_v48  ;;  %v779_v52 = vld [vmem:[%s1402_s6 + $0x8] sm:$0xff] (!%p296_p2)  ;;  %v780_v53 = vld [vmem:[%s1402_s6 + $0x10] sm:$0xff] (!%p296_p2)  ;;  %v781_v55 = vld [vmem:[%s1402_s6 + $0x18] sm:$0xff] (!%p296_p2) }
   0xb   : > { %v1167_v54 = vpack.c.bf16 (!%p296_p2), %v779_v52, %v778_v51  ;;  %v1170_v56 = vpack.c.bf16 (!%p296_p2), %v781_v55, %v780_v53  ;;  %v782_v57 = vld [vmem:[%s1402_s6 + $0x20] sm:$0xff] (!%p296_p2)  ;;  %v783_v58 = vld [vmem:[%s1402_s6 + $0x28] sm:$0xff] (!%p296_p2) }
   0xc   : > { %1153 = vmatpush3.bf16.msra.mxu1 (!%p296_p2), %v1152_v7  ;;  %v1173_v59 = vpack.c.bf16 (!%p296_p2), %v783_v58, %v782_v57  ;;  %v670_v2 = vld [vmem:[%s1404_s8] sm:$0xff] (!%p296_p2) }
   0xd   : > { %s1407_s10 = smov (!%p333_p3, %s1032_s10), 1  ;;  %1092 = vmatprep.subr.mxu1 %v1209_v6  ;;  %v689_v5 = vrot.slane %v670_v2, %v688_v1 }
   0xe   : > { %s1037_s19 = sshll.u32 %s1407_s10, 3 }
   0xf   : > { %s336_s22 = scalar_lea.vmem %s1396_s0, %s1037_s19  ;;  %s340_s25 = scalar_lea.vmem %s1397_s1, %s1037_s19 }
  0x10   : > { %v345_v8 = vld [vmem:[%s336_s22] sm:$0xff] }
  0x11   : > { %v346_v9 = vld [vmem:[%s340_s25] sm:$0xff] }
  0x12   : > { %v347_v11 = vadd.f32 %v346_v9, %v345_v8  ;;  %v694_v9 = vrot.slane %v670_v2, %v693_v4 }
  0x14   : > { %v349_v12 = vadd.f32 %v348_v10, %v347_v11 }
  0x16   : > { %1090 = vmatmul.mubr.msk.f32.vlgmr.msra.gmra.mrb[0].mxu1 %vm354_vm1, %v349_v12 }
  0x17   : > { %1094 = vmatprep.mubr.msk.f32.mxu1 %vm1208_vm0, %v1209_v6 }
  0xe9   : > { %v424_v13 = vpop.f32.mrb[0].mxu1 }
  0xea   : > { %429 = vrot.lane.b32.xlu0 %v424_v13, %s1210_s28  ;;  %v1091_v14 = vpop.f32.mrb[1].mxu1  ;;  %s1039_s28 = sshll.u32 %s1407_s10, 1 }
  0xeb   : > { %v702_v14 = vsub.s32 2, %v687_v0  ;;  %s344_s12 = scalar_lea.vmem %s1405_s9, %s1039_s28 }
 0x15c   : > { %v430_v15 = vpop.permute.xlu0 %429 }
 0x15d   : > { %1093 = vmatpush3.xpose.msk.msra.mxu1 %vm354_vm1, %v430_v15  ;;  %v703_v15 = vrot.slane %v670_v2, %v702_v14 }
 0x15e   : > { %1160 = vmatprep.subr.bf16.mxu1 %v1207_v3 }
 0x160   : > { %1095 = vmatmul.mubr.msk.f32.vlgmr.msra.gmra.mrb[2].mxu1 %vm354_vm1, %v424_v13 }
 0x161   : > { %1121 = vmatprep.mubr.msk.f32.mxu1 %vm1208_vm0, %v1209_v6  ;;  %1162 = vmatpush3.bf16.msra.mxu1 %v1161_v47 }
 0x162   : > { %1163 = vmatprep.subr.bf16.mxu1 %v1207_v3 }
 0x165   : > { %1165 = vmatpush3.bf16.msra.mxu1 %v1164_v50 }
 0x166   : > { %1143 = vmatprep.subr.mxu1 %v1209_v6 }
 0x233   : > { %v501_v16 = vpop.f32.mrb[2].mxu1 }
 0x234   : > { %v1096_v17 = vpop.f32.mrb[3].mxu1  ;;  %v506_v18 = vsel %vm505_vm2, %v501_v16, -inf }
 0x235   : > { %507 = vmax.xlane.f32.xlu0 %v506_v18 }
 0x2c2   : > { %v508_v19 = vpop.xlane.xlu0 %507 }
 0x2c3   : > { %v509_v20 = vsub.f32 %v501_v16, %v508_v19 }
 0x2c5   : > { %v510_v21 = vmul.f32 1.442695, %v509_v20  ;;  %v788_v20 = vsub.s32 3, %v687_v0 }
 0x2c7   : > { %1191 = vpow2.f32 %v510_v21 }
 0x2d1   : > { %v1192_v22 = vpop.eup %1191 }
 0x2d2   : > { %v512_v23 = vsel %vm505_vm2, %v1192_v22, 0.0 }
 0x2d3   : > { %513 = vadd.xlane.f32.xlu1 %v512_v23 }
 0x2e4   : > { %517 = vrot.lane.b32.xlu1 %v424_v13, %s1211_s29 }
 0x360   : > { %v514_v24 = vpop.xlane.xlu1 %513 }
 0x361   : > { %1193 = vrcp.f32 %v514_v24 }
 0x364   : > { %v518_v25 = vpop.permute.xlu1 %517 }
 0x365   : > { %1098 = vmatpush3.msra.mxu0 %v518_v25 }
 0x366   : > { %1154 = vmatprep.subr.bf16.mxu0 %v1207_v3 }
 0x36b   : > { %v1194_v28 = vpop.eup %1193 }
 0x36c   : > { %v516_v30 = vmul.f32 %v1194_v28, %v1192_v22 }
 0x36e   : > { %1100 = vmatmul.mubr.msk.f32.vlgmr.msra.gmra.mrb[0].mxu0 %vm505_vm2, %v516_v30 }
 0x36f   : > { %1156 = vmatpush3.bf16.msra.mxu0 %v1155_v29  ;;  %1110 = vmatprep.mubr.msk.f32.mxu0 %vm1208_vm0, %v1209_v6 }
 0x370   : > { %1157 = vmatprep.subr.bf16.mxu0 %v1207_v3 }
 0x373   : > { %1159 = vmatpush3.bf16.msra.mxu0 %v1158_v33 }
 0x374   : > { %1166 = vmatprep.subr.bf16.mxu0 %v1207_v3 }
 0x441   : > { %v589_v34 = vpop.f32.mrb[0].mxu0 }
 0x442   : > { %v1101_v35 = vpop.f32.mrb[1].mxu0  ;;  %1111 = vmatmul.mubr.msk.f32.vlgmr.msra.gmra.mrb[2].mxu0 %vm354_vm1, %v589_v34  ;;  %v880_v34 = vsub.s32 4, %v687_v0 }
 0x443   : > { %1140 = vmatprep.mubr.msk.f32.mxu0 %vm1208_vm0, %v1209_v6  ;;  %1168 = vmatpush3.bf16.msra.mxu0 %v1167_v54  ;;  %v885_v35 = vsub.s32 5, %v687_v0 }
 0x444   : > { %1169 = vmatprep.subr.bf16.mxu0 %v1207_v3 }
 0x447   : > { %1171 = vmatpush3.bf16.msra.mxu0 %v1170_v56 }
 0x448   : > { %1172 = vmatprep.subr.bf16.mxu0 %v1207_v3 }
 0x44b   : > { %1174 = vmatpush3.bf16.msra.mxu0 %v1173_v59 }
 0x44c   : > { %1175 = vmatprep.subr.bf16.mxu0 %v1207_v3  ;;  %v784_v3 = vld [vmem:[%s1402_s6 + $0x30] sm:$0xff] }
 0x515   : > { %v666_v36 = vpop.f32.mrb[2].mxu0 }
 0x516   : > { %v671_v37 = vadd.f32 %v666_v36, %v349_v12  ;;  %v1112_v38 = vpop.f32.mrb[3].mxu0  ;;  %v785_v12 = vld [vmem:[%s1402_s6 + $0x38] sm:$0xff]  ;;  %v881_v36 = vrot.slane %v670_v2, %v880_v34 }
 0x517   : > { %v1176_v13 = vpack.c.bf16 %v785_v12, %v784_v3 }
 0x518   : > { %v672_v39 = vsel %vm354_vm1, %v671_v37, 0.0 }
 0x519   : > { %673 = vadd.xlane.f32.xlu1 %v672_v39  ;;  %1177 = vmatpush3.bf16.msra.mxu0 %v1176_v13  ;;  %v886_v39 = vrot.slane %v670_v2, %v885_v35 }
 0x5a6   : > { %v674_v40 = vpop.xlane.xlu1 %673 }
 0x5a7   : > { %v676_v41 = vmul.f32 0.03125, %v674_v40 }
 0x5a9   : > { %v677_v42 = vsub.f32 %v671_v37, %v676_v41 }
 0x5ab   : > { %v678_v43 = vmul.f32 %v677_v42, %v677_v42 }
 0x5ad   : > { %v679_v44 = vsel %vm354_vm1, %v678_v43, 0.0 }
 0x5ae   : > { %680 = vadd.xlane.f32.xlu0 %v679_v44 }
 0x63b   : > { %v681_v60 = vpop.xlane.xlu0 %680 }
 0x63c   : > { %v682_v61 = vmul.f32 0.03125, %v681_v60 }
 0x63e   : > { %v683_v63 = vadd.f32 1e-05, %v682_v61 }
 0x640   : > { %1195 = vrsqrt.f32 %v683_v63 }
 0x64a   : > { %v1196_v7 = vpop.eup %1195 }
 0x64b   : > { %v685_v8 = vmul.f32 %v1196_v7, %v677_v42  ;;  %v888_v42 = vld [vmem:[%s1403_s7] sm:$0x3] }
 0x64d   : > { %v690_v10 = vmul.f32 %v689_v5, %v685_v8 }
 0x64f   : > { %v695_v11 = vadd.f32 %v694_v9, %v690_v10 }
 0x651   : > { %1122 = vmatmul.mubr.msk.f32.vlgmr.msra.gmra.mrb[4].mxu1 %vm354_vm1, %v695_v11 }
 0x652   : > { %1145 = vmatprep.mubr.msk.f32.mxu1 %vm1208_vm0, %v1209_v6  ;;  %v789_v6 = vrot.slane %v670_v2, %v788_v20 }
 0x724   : > { %v773_v16 = vpop.f32.mrb[4].mxu1 }
 0x725   : > { %v774_v17 = vadd.f32 %v773_v16, %v703_v15  ;;  %v1123_v18 = vpop.f32.mrb[5].mxu1 }
 0x727   : > { %v777_v19 = vmax.f32 %v774_v17, 0.0 }
 0x729   : > { %1141 = vmatmul.mubr.msk.f32.vlgmr.msra.gmra.mrb[4].mxu0 %vm790_vm3, %v777_v19 }
 0x7fc   : > { %v860_v21 = vpop.f32.mrb[4].mxu0 }
 0x7fd   : > { %v861_v22 = vadd.f32 %v860_v21, %v789_v6  ;;  %v1142_v23 = vpop.f32.mrb[5].mxu0 }
 0x7ff   : > { %v864_v24 = vadd.f32 %v861_v22, %v695_v11 }
 0x801   : > { %v865_v25 = vsel %vm354_vm1, %v864_v24, 0.0 }
 0x802   : > { %866 = vadd.xlane.f32.xlu0 %v865_v25 }
 0x88f   : > { %v867_v26 = vpop.xlane.xlu0 %866 }
 0x890   : > { %v868_v27 = vmul.f32 0.03125, %v867_v26 }
 0x892   : > { %v869_v28 = vsub.f32 %v864_v24, %v868_v27 }
 0x894   : > { %v870_v29 = vmul.f32 %v869_v28, %v869_v28 }
 0x896   : > { %v871_v30 = vsel %vm354_vm1, %v870_v29, 0.0 }
 0x897   : > { %872 = vadd.xlane.f32.xlu0 %v871_v30 }
 0x924   : > { %v873_v31 = vpop.xlane.xlu0 %872 }
 0x925   : > { %v874_v32 = vmul.f32 0.03125, %v873_v31 }
 0x927   : > { %v875_v33 = vadd.f32 1e-05, %v874_v32 }
 0x929   : > { %1197 = vrsqrt.f32 %v875_v33 }
 0x933   : > { %v1198_v37 = vpop.eup %1197 }
 0x934   : > { %v877_v38 = vmul.f32 %v1198_v37, %v869_v28 }
 0x936   : > { %v882_v40 = vmul.f32 %v881_v36, %v877_v38 }
 0x938   : > { %v887_v41 = vadd.f32 %v886_v39, %v882_v40 }
 0x93a   : > { %1144 = vmatpush3.xpose.msk.msra.mxu1 %vm354_vm1, %v887_v41 }
 0x93d   : > { %1146 = vmatmul.mubr.msk.f32.vlgmr.msra.gmra.mrb[6].mxu1 %vm354_vm1, %v888_v42 }
 0xa10   : > { %v961_v43 = vpop.f32.mrb[6].mxu1 }
 0xa11   : > { %966 = vst.msk [vmem:[%s344_s12] sm:$0x3] %vm965_vm4, %v961_v43  ;;  %v1147_v44 = vpop.f32.mrb[7].mxu1 }
 0xa12 PF: > { %s19_s30 = sadd.s32 1, %s1205_s30  }
 0xa13   : > { %p16_p4 = scmp.ge.s32.totalorder %s19_s30, 4  }
 0xa15   :  { %18 = sbr.rel (!%p16_p4) target bundleno = 1 (0x1), region = 89 }

</bundles_post_ra>
